<compile_context>
chip_gen: v7x
topology: tpu7x:2x2x1
jax: 0.10.0
libtpu: 0.0.40
codegen_flags: <defaults>
</compile_context>

<pallas_src>
import jax
import jax.numpy as jnp
from jax.experimental import pallas as pl
from jax.experimental.pallas import tpu as pltpu

IN_FEATURES = 28 ** 2   # 784
OUT_FEATURES = 10
N_PAD = 128             # lane-dense padded output width
TM_MAX = 1024           # cap: ~8 MiB double-buffered, safe on v5e scoped VMEM


def _round_up(n, m):
    return (n + m - 1) // m * m


def linear_sub_kernel(x_ref, w_ref, b_ref, o_ref):
    # x_ref: (TM, 784) f32, w_ref: (784, 128) bf16, b_ref: (1, 128) f32
    x_bf = x_ref[...].astype(jnp.bfloat16)          # free VPU cast in-kernel
    y = jnp.dot(x_bf, w_ref[...], preferred_element_type=jnp.float32)
    # bias already has the "-5" folded in; identity activation (see TODO).
    o_ref[...] = y + b_ref[...]


def prepare_params(w, b):
    """One-time prep: (784,10) f32 w, (1,10) f32 b -> padded kernel params."""
    w_p = jnp.pad(w.astype(jnp.bfloat16),
                  ((0, 0), (0, N_PAD - OUT_FEATURES)))
    b_p = jnp.pad((b - 5.0).astype(jnp.float32),
                  ((0, 0), (0, N_PAD - OUT_FEATURES)))
    return w_p, b_p


def _pick_tm(B):
    if B <= 128:
        # tiny batch: a single sublane-aligned tile
        return max(8, _round_up(B, 8))
    # real batch: big tiles for HBM roofline, but >= 2 grid steps so both
    # TensorCores get work on v7x; capped for v5e scoped-VMEM headroom.
    half = (_round_up(B, 128) // 2) // 128 * 128
    return min(TM_MAX, max(128, half))


def model_forward(x, w_p, b_p):
    """x: (B, 784) f32, w_p: (784, 128) bf16, b_p: (1, 128) f32 -> (B, 10) f32."""
    B = x.shape[0]
    TM = _pick_tm(B)
    Bp = _round_up(B, TM)

    # Only pad the batch when the tile does not already divide it.
    x_p = x if Bp == B else jnp.pad(x, ((0, Bp - B), (0, 0)))

    out_padded = pl.pallas_call(
        linear_sub_kernel,
        out_shape=jax.ShapeDtypeStruct((Bp, N_PAD), jnp.float32),
        grid=(Bp // TM,),
        in_specs=[
            pl.BlockSpec((TM, IN_FEATURES), lambda i: (i, 0)),
            pl.BlockSpec((IN_FEATURES, N_PAD), lambda i: (0, 0)),
            pl.BlockSpec((1, N_PAD), lambda i: (0, 0)),
        ],
        out_specs=pl.BlockSpec((TM, N_PAD), lambda i: (i, 0)),
        compiler_params=pltpu.CompilerParams(
            dimension_semantics=("parallel",)),
    )(x_p, w_p, b_p)

    return out_padded[:B, :OUT_FEATURES]


def init_params(key):
    # Deterministic init mimicking nn.Linear default (uniform +/- 1/sqrt(fan_in)).
    kw, kb = jax.random.split(key)
    bound = 1.0 / (IN_FEATURES ** 0.5)
    # PyTorch stores weight as (out, in); we store its transpose (in, out).
    w = jax.random.uniform(
        kw, (IN_FEATURES, OUT_FEATURES), jnp.float32, -bound, bound)
    b = jax.random.uniform(
        kb, (1, OUT_FEATURES), jnp.float32, -bound, bound)
    return w, b


if __name__ == "__main__":
    key = jax.random.PRNGKey(0)
    kx, kp = jax.random.split(key)

    w, b = init_params(kp)
    w_p, b_p = prepare_params(w, b)          # one-time param prep
    fwd = jax.jit(model_forward)

    def check(batch, kseed):
        x = jax.random.normal(jax.random.fold_in(kx, kseed),
                              (batch, IN_FEATURES), jnp.float32)
        out = fwd(x, w_p, b_p)
        jax.block_until_ready(out)
        assert out.shape == (batch, OUT_FEATURES)
        # Reference with the same bf16 operand precision (f32 accumulate).
        ref_bf = (jnp.dot(x.astype(jnp.bfloat16), w.astype(jnp.bfloat16),
                          preferred_element_type=jnp.float32) + b - 5.0)
        assert jnp.allclose(out, ref_bf, atol=2e-3, rtol=2e-3)
        # Also close to full-f32 math.
        ref_f32 = x @ w + b - 5.0
        assert jnp.allclose(out, ref_f32, atol=5e-2, rtol=5e-2)

    # Spec input: x1 = torch.randn(1, 28**2)
    check(1, 0)
    # Also exercise the multi-tile "parallel" grid path.
    check(256, 1)

    print("KERNEL_OK")
</pallas_src>

<mosaic_0001>
module attributes {stable_mosaic.version = 11 : i64} {
  func.func @linear_sub_kernel(%arg0: i32, %arg1: memref<8x784xf32, #tpu.memory_space<vmem>>, %arg2: memref<784x128xbf16, #tpu.memory_space<vmem>>, %arg3: memref<1x128xf32, #tpu.memory_space<vmem>>, %arg4: memref<8x128xf32, #tpu.memory_space<vmem>>) attributes {dimension_semantics = [#tpu.dimension_semantics<parallel>], iteration_bounds = array<i64: 1>, scalar_prefetch = 0 : i64, scratch_operands = 0 : i64, tpu.core_type = #tpu.core_type<tc>, window_params = [{transform_indices = @transform_0, window_bounds = array<i64: 8, 784>}, {pipeline_mode = #tpu.pipeline_mode<synchronous>, transform_indices = @transform_1, window_bounds = array<i64: 784, 128>}, {pipeline_mode = #tpu.pipeline_mode<synchronous>, transform_indices = @transform_2, window_bounds = array<i64: 1, 128>}, {transform_indices = @transform_3, window_bounds = array<i64: 8, 128>}]} {
    %c0 = arith.constant 0 : index
    %c0_0 = arith.constant 0 : index
    %0 = vector.load %arg1[%c0, %c0_0] : memref<8x784xf32, #tpu.memory_space<vmem>>, vector<8x784xf32>
    %1 = arith.truncf %0 : vector<8x784xf32> to vector<8x784xbf16>
    %c0_1 = arith.constant 0 : index
    %c0_2 = arith.constant 0 : index
    %2 = vector.load %arg2[%c0_1, %c0_2] : memref<784x128xbf16, #tpu.memory_space<vmem>>, vector<784x128xbf16>
    %cst = arith.constant dense<0.000000e+00> : vector<8x128xf32>
    %3 = tpu.matmul %1, %2, %cst {dimension_numbers = #tpu.dot_dimension_numbers<[1], [0], [0], [1], [0, 0, 1, 1], [], []>} : vector<8x784xbf16>, vector<784x128xbf16>, vector<8x128xf32> -> vector<8x128xf32>
    %c0_3 = arith.constant 0 : index
    %c0_4 = arith.constant 0 : index
    %4 = vector.load %arg3[%c0_3, %c0_4] : memref<1x128xf32, #tpu.memory_space<vmem>>, vector<1x128xf32>
    %5 = vector.broadcast %4 : vector<1x128xf32> to vector<8x128xf32>
    %6 = arith.addf %3, %5 : vector<8x128xf32>
    %c0_5 = arith.constant 0 : index
    %c0_6 = arith.constant 0 : index
    %7 = vector.load %arg4[%c0_5, %c0_6] : memref<8x128xf32, #tpu.memory_space<vmem>>, vector<8x128xf32>
    tpu.vector_store %arg4[%c0_5, %c0_6], %6 {strides = array<i32>} : memref<8x128xf32, #tpu.memory_space<vmem>>, vector<8x128xf32>,
    return
  }
  func.func @transform_0(%arg0: i32) -> (i32, i32) {
    %c0_i32 = arith.constant 0 : i32
    %c0_i32_0 = arith.constant 0 : i32
    return %arg0, %c0_i32 : i32, i32
  }
  func.func @transform_1(%arg0: i32) -> (i32, i32) {
    %c0_i32 = arith.constant 0 : i32
    %c0_i32_0 = arith.constant 0 : i32
    %c0_i32_1 = arith.constant 0 : i32
    return %c0_i32, %c0_i32_0 : i32, i32
  }
  func.func @transform_2(%arg0: i32) -> (i32, i32) {
    %c0_i32 = arith.constant 0 : i32
    %c0_i32_0 = arith.constant 0 : i32
    %c0_i32_1 = arith.constant 0 : i32
    return %c0_i32, %c0_i32_0 : i32, i32
  }
  func.func @transform_3(%arg0: i32) -> (i32, i32) {
    %c0_i32 = arith.constant 0 : i32
    %c0_i32_0 = arith.constant 0 : i32
    return %arg0, %c0_i32 : i32, i32
  }
}

</mosaic_0001>

<bundles_post_ra>
// kernel: model_forward.1
= control target key start
LH: loop header
LB: loop body
LE: loop exit
PB: predicated region body
PF: predicated region fallthrough
CT: control target
= control target key end

     0   :  { %8 = vsyncpa [#allocation3], 0  ;;  %s815_s12 = smov [#allocation2]   ;;  %s879_s0 = inlined_call_operand.vmem [shape: f32[8,784], index: 0, kind: input, shape index: {}]   ;;  %s880_s1 = inlined_call_operand.hbm [shape: bf16[784,128], index: 1, kind: input, shape index: {}]   ;;  %s881_s2 = inlined_call_operand.vmem [shape: f32[1,128], index: 2, kind: input, shape index: {}]   ;;  %s882_s3 = inlined_call_operand.vmem [shape: f32[8,128], index: 3, kind: output, shape index: {}]  }
   0x1   :  { %s16_s13 = sshll.u32 %s815_s12, 4  ;;  %s791_s16 = scalar_lea.hbm %s880_s1, 6272  ;;  %s17_s13 = int_to_ptr.vmem [resolvable:$true] %s16_s13 }
   0x2   :  { %p792_p0 = scmp.ne.s32.totalorder %s880_s1, %s791_s16  ;;  %p795_p1 = scmp.lt.u32.totalorder %s791_s16, %s880_s1 }
   0x4   :  { %p797_p2 = pnand %p795_p1, %p792_p0 }
   0x6   :  { %800 = shalt.err (!%p797_p2)
}
   0x7   :  { %s801_s21 = scalar_lea.vmem %s17_s13, 6272  ;;  %p806_p4 = scmp.lt.s32.totalorder %s17_s13, %s17_s13 }
   0x8   :  { %p802_p3 = scmp.ne.s32.totalorder %s17_s13, %s801_s21  ;;  %p807_p5 = scmp.lt.s32.totalorder %s801_s21, %s801_s21 }
   0xa   :  { %p808_p6 = por %p807_p5, %p806_p4 }
   0xc   :  { %p809_p7 = pnand %p808_p6, %p802_p3 }
   0xe   :  { %812 = shalt.err (!%p809_p7)
}
   0xf   :  { %s816_s22 = smov 64   ;;  %s817_s23 = smov 4  }
  0x10   :  { %22 = dma.hbm_to_vmem [thread:$0]  %s880_s1, 6272, %s17_s13, [#allocation3], %s816_s22, %s816_s22, %s817_s23  }
  0x11   :  { %813 = dma.done.wait [#allocation3], 6272  }
  0x12   :  { %814 = vsyncadd [#allocation3], 4294961024  ;;  %v742_v0 = vld [vmem:[#allocation2 + $0x40] sm:$0xff]   ;;  %v746_v4 = vld [vmem:[#allocation2 + $0x48] sm:$0xff]   ;;  %v818_v44 = vmov 0.0   ;;  %vm819_vm0 = vmmov 0  }
  0x13   :  { %v743_v1 = vld [vmem:[#allocation2] sm:$0xff]   ;;  %663 = vmatprep.subr.bf16.mxu0 %v742_v0  ;;  %v747_v5 = vld [vmem:[#allocation2 + $0x8] sm:$0xff]   ;;  %v750_v8 = vld [vmem:[#allocation2 + $0x50] sm:$0xff]   ;;  %vm442_vm1 = vcmask 130048  }
  0x14   :  { %v744_v2 = vld [vmem:[#allocation2 + $0xc0] sm:$0xff]   ;;  %664 = vmatpush3.bf16.msra.mxu0 %v743_v1  ;;  %v748_v6 = vld [vmem:[#allocation2 + $0xc8] sm:$0xff]   ;;  %v751_v9 = vld [vmem:[#allocation2 + $0x10] sm:$0xff]  }
  0x15   :  { %v745_v3 = vld [vmem:[#allocation2 + $0x80] sm:$0xff]   ;;  %685 = vmatprep.subr.bf16.mxu1 %v744_v2  ;;  %665 = vmatprep.subr.bf16.mxu0 %v746_v4  ;;  %v749_v7 = vld [vmem:[#allocation2 + $0x88] sm:$0xff]   ;;  %v752_v10 = vld [vmem:[#allocation2 + $0xd0] sm:$0xff]  }
  0x16   :  { %686 = vmatpush3.bf16.msra.mxu1 %v745_v3  ;;  %v753_v11 = vld [vmem:[#allocation2 + $0x90] sm:$0xff]   ;;  %v754_v12 = vld [vmem:[#allocation2 + $0x58] sm:$0xff]   ;;  %v758_v16 = vld [vmem:[#allocation2 + $0x60] sm:$0xff]  }
  0x17   :  { %687 = vmatprep.subr.bf16.mxu1 %v748_v6  ;;  %v755_v13 = vld [vmem:[#allocation2 + $0x18] sm:$0xff]   ;;  %v759_v17 = vld [vmem:[#allocation2 + $0x20] sm:$0xff]   ;;  %v762_v20 = vld [vmem:[#allocation2 + $0x68] sm:$0xff]  }
  0x18   :  { %666 = vmatpush3.bf16.msra.mxu0 %v747_v5  ;;  %v756_v14 = vld [vmem:[#allocation2 + $0xd8] sm:$0xff]   ;;  %v760_v18 = vld [vmem:[#allocation2 + $0xe0] sm:$0xff]   ;;  %v763_v21 = vld [vmem:[#allocation2 + $0x28] sm:$0xff]  }
  0x19   :  { %667 = vmatprep.subr.bf16.mxu0 %v750_v8  ;;  %v757_v15 = vld [vmem:[#allocation2 + $0x98] sm:$0xff]   ;;  %v761_v19 = vld [vmem:[#allocation2 + $0xa0] sm:$0xff]   ;;  %v764_v22 = vld [vmem:[#allocation2 + $0xe8] sm:$0xff]  }
  0x1a   :  { %688 = vmatpush3.bf16.msra.mxu1 %v749_v7  ;;  %v765_v23 = vld [vmem:[#allocation2 + $0xa8] sm:$0xff]   ;;  %v766_v24 = vld [vmem:[#allocation2 + $0x70] sm:$0xff]   ;;  %v770_v28 = vld [vmem:[#allocation2 + $0x78] sm:$0xff]  }
  0x1b   :  { %689 = vmatprep.subr.bf16.mxu1 %v752_v10  ;;  %v767_v25 = vld [vmem:[#allocation2 + $0x30] sm:$0xff]   ;;  %v771_v29 = vld [vmem:[#allocation2 + $0x38] sm:$0xff]   ;;  %v30_v31 = vld [vmem:[%s879_s0 + $0x8] sm:$0xff] }
  0x1c   :  { %668 = vmatpush3.bf16.msra.mxu0 %v751_v9  ;;  %v768_v26 = vld [vmem:[#allocation2 + $0xf0] sm:$0xff]   ;;  %v772_v30 = vld [vmem:[#allocation2 + $0xf8] sm:$0xff]   ;;  %v37_v32 = vpack.c.bf16 %v30_v31, %v30_v31  ;;  %v29_v34 = vld [vmem:[%s879_s0] sm:$0xff] }
  0x1d   :  { %669 = vmatprep.subr.bf16.mxu0 %v754_v12  ;;  %v769_v27 = vld [vmem:[#allocation2 + $0xb0] sm:$0xff]   ;;  %v773_v33 = vld [vmem:[#allocation2 + $0xb8] sm:$0xff]   ;;  %v36_v35 = vpack.c.bf16 %v29_v34, %v29_v34  ;;  %v774_v36 = vld [vmem:[#allocation2 + $0x140] sm:$0xff]  }
  0x1e   :  { %690 = vmatpush3.bf16.msra.mxu1 %v753_v11  ;;  %v32_v37 = vld [vmem:[%s879_s0 + $0x18] sm:$0xff]  ;;  %478 = vmatprep.mubr.bf16.mxu0 %v37_v32  ;;  %v775_v39 = vld [vmem:[#allocation2 + $0x100] sm:$0xff]   ;;  %v31_v40 = vld [vmem:[%s879_s0 + $0x10] sm:$0xff] }
  0x1f   :  { %691 = vmatprep.subr.bf16.mxu1 %v756_v14  ;;  %v39_v38 = vpack.c.bf16 %v32_v37, %v32_v37  ;;  %v38_v41 = vpack.c.bf16 %v31_v40, %v31_v40  ;;  %v776_v42 = vld [vmem:[#allocation2 + $0x148] sm:$0xff]   ;;  %v778_v45 = vld [vmem:[#allocation2 + $0x150] sm:$0xff]   ;;  %v780_v47 = vld [vmem:[#allocation2 + $0x158] sm:$0xff]  }
  0x20   :  { %670 = vmatpush3.bf16.msra.mxu0 %v755_v13  ;;  %v777_v43 = vld [vmem:[#allocation2 + $0x108] sm:$0xff]   ;;  %v779_v46 = vld [vmem:[#allocation2 + $0x110] sm:$0xff]   ;;  %v781_v48 = vld [vmem:[#allocation2 + $0x118] sm:$0xff]  }
  0x21   :  { %671 = vmatprep.subr.bf16.mxu0 %v758_v16  ;;  %518 = vmatprep.mubr.bf16.mxu1 %v39_v38  ;;  %v782_v49 = vld [vmem:[#allocation2 + $0x160] sm:$0xff]   ;;  %v784_v51 = vld [vmem:[#allocation2 + $0x168] sm:$0xff]   ;;  %v35_v55 = vld [vmem:[%s879_s0 + $0x30] sm:$0xff] }
  0x22   :  { %692 = vmatpush3.bf16.msra.mxu1 %v757_v15  ;;  %v783_v50 = vld [vmem:[#allocation2 + $0x120] sm:$0xff]   ;;  %v34_v53 = vld [vmem:[%s879_s0 + $0x28] sm:$0xff]  ;;  %v42_v57 = vpack.c.bf16 %v35_v55, %v35_v55  ;;  %v786_v58 = vld [vmem:[#allocation2 + $0x170] sm:$0xff]  }
  0x23   :  { %693 = vmatprep.subr.bf16.mxu1 %v760_v18  ;;  %v790_v52 = vld [vmem:[#allocation2 + $0x180] sm:$0xff]   ;;  %v41_v54 = vpack.c.bf16 %v34_v53, %v34_v53  ;;  %v785_v56 = vld [vmem:[#allocation2 + $0x128] sm:$0xff]   ;;  %v787_v59 = vld [vmem:[#allocation2 + $0x130] sm:$0xff]  }
  0x24   :  { %672 = vmatpush3.bf16.msra.mxu0 %v759_v17  ;;  %v788_v60 = vld [vmem:[#allocation2 + $0x178] sm:$0xff]   ;;  %v33_v62 = vld [vmem:[%s879_s0 + $0x20] sm:$0xff] }
  0x25   :  { %673 = vmatprep.subr.bf16.mxu0 %v762_v20  ;;  %v789_v61 = vld [vmem:[#allocation2 + $0x138] sm:$0xff]   ;;  %v40_v63 = vpack.c.bf16 %v33_v62, %v33_v62  ;;  %v612_v1 = vld [vmem:[%s881_s2] ss:$0 sm:$0xff] }
  0x26   :  { %694 = vmatpush3.bf16.msra.mxu1 %v761_v19 }
  0x27   :  { %695 = vmatprep.subr.bf16.mxu1 %v764_v22 }
  0x28   :  { %674 = vmatpush3.bf16.msra.mxu0 %v763_v21 }
  0x29   :  { %675 = vmatprep.subr.bf16.mxu0 %v766_v24 }
  0x2a   :  { %696 = vmatpush3.bf16.msra.mxu1 %v765_v23 }
  0x2b   :  { %697 = vmatprep.subr.bf16.mxu1 %v768_v26 }
  0x2c   :  { %676 = vmatpush3.bf16.msra.mxu0 %v767_v25 }
  0x2d   :  { %677 = vmatprep.subr.bf16.mxu0 %v770_v28 }
  0x2e   :  { %698 = vmatpush3.bf16.msra.mxu1 %v769_v27 }
  0x2f   :  { %699 = vmatprep.subr.bf16.mxu1 %v772_v30 }
  0x30   :  { %678 = vmatpush3.bf16.msra.mxu0 %v771_v29 }
  0x31   :  { %707 = vmatprep.subr.bf16.mxu0 %v774_v36 }
  0x32   :  { %700 = vmatpush3.bf16.msra.mxu1 %v773_v33 }
  0x33   :  { %479 = vmatmul.mubr.bf16.vlgmr.msra.gmra.mrb[0].mxu0 %v36_v35  ;;  %731 = vmatprep.subr.bf16.mxu1 %v818_v44 }
  0x34   :  { %708 = vmatpush3.bf16.msra.mxu0 %v775_v39  ;;  %558 = vmatprep.mubr.bf16.mxu0 %v41_v54 }
  0x35   :  { %519 = vmatmul.mubr.bf16.vlgmr.msra.gmra.mrb[0].mxu1 %v38_v41  ;;  %709 = vmatprep.subr.bf16.mxu0 %v776_v42 }
  0x36   :  { %733 = vmatprep.mubr.msk.bf16.mxu1 %vm819_vm0, %v818_v44  ;;  %732 = vmatpush3.bf16.msra.mxu1 %v790_v52 }
  0x38   :  { %710 = vmatpush3.bf16.msra.mxu0 %v777_v43 }
  0x39   :  { %711 = vmatprep.subr.bf16.mxu0 %v778_v45 }
  0x3c   :  { %712 = vmatpush3.bf16.msra.mxu0 %v779_v46 }
  0x3d   :  { %713 = vmatprep.subr.bf16.mxu0 %v780_v47  ;;  %734 = vmatmul.mubr.msk.bf16.vlgmr.msra.gmra.mrb[4].mxu1 %vm442_vm1, %v42_v57 }
  0x40   :  { %714 = vmatpush3.bf16.msra.mxu0 %v781_v48 }
  0x41   :  { %715 = vmatprep.subr.bf16.mxu0 %v782_v49 }
  0x44   :  { %716 = vmatpush3.bf16.msra.mxu0 %v783_v50 }
  0x45   :  { %717 = vmatprep.subr.bf16.mxu0 %v784_v51 }
  0x48   :  { %718 = vmatpush3.bf16.msra.mxu0 %v785_v56 }
  0x49   :  { %719 = vmatprep.subr.bf16.mxu0 %v786_v58 }
  0x4c   :  { %720 = vmatpush3.bf16.msra.mxu0 %v787_v59 }
  0x4d   :  { %721 = vmatprep.subr.bf16.mxu0 %v788_v60 }
  0x50   :  { %722 = vmatpush3.bf16.msra.mxu0 %v789_v61 }
  0x53   :  { %559 = vmatmul.mubr.bf16.vlgmr.msra.gmra.mrb[4].mxu0 %v40_v63 }
 0x106   :  { %v679_v0 = vpop.f32.mrb[0].mxu0 }
 0x107   :  { %v680_v2 = vpop.f32.mrb[1].mxu0 }
 0x108   :  { %v681_v3 = vadd.f32 %v680_v2, %v679_v0  ;;  %v682_v4 = vpop.f32.mrb[2].mxu0  ;;  %v701_v5 = vpop.f32.mrb[0].mxu1 }
 0x109   :  { %v683_v6 = vpop.f32.mrb[3].mxu0  ;;  %v702_v8 = vpop.f32.mrb[1].mxu1 }
 0x10a   :  { %v481_v7 = vadd.f32 %v681_v3, %v612_v1  ;;  %v703_v9 = vadd.f32 %v702_v8, %v701_v5  ;;  %v704_v10 = vpop.f32.mrb[2].mxu1 }
 0x10b   :  { %v705_v11 = vpop.f32.mrb[3].mxu1 }
 0x10c   :  { %v521_v12 = vadd.f32 %v703_v9, %v481_v7 }
 0x110   :  { %v600_v13 = vpop.f32.mrb[4].mxu1 }
 0x111   :  { %v735_v14 = vpop.f32.mrb[5].mxu1 }
 0x112   :  { %v603_v15 = vpop.f32.mrb[6].mxu1 }
 0x113   :  { %v736_v16 = vpop.f32.mrb[7].mxu1 }
 0x126   :  { %v723_v17 = vpop.f32.mrb[4].mxu0 }
 0x127   :  { %v724_v18 = vpop.f32.mrb[5].mxu0 }
 0x128   :  { %v725_v19 = vadd.f32 %v724_v18, %v723_v17  ;;  %v726_v20 = vpop.f32.mrb[6].mxu0 }
 0x129   :  { %v727_v21 = vpop.f32.mrb[7].mxu0 }
 0x12a   :  { %v561_v22 = vadd.f32 %v725_v19, %v521_v12 }
 0x12c   :  { %v601_v23 = vadd.f32 %v600_v13, %v561_v22 }
 0x12e   :  { %606 = vst [vmem:[%s882_s3] sm:$0xff] %v601_v23 }
 0x12f   :  { %611 = vsyncpa [#allocation3], 1 }

</bundles_post_ra>
